<compile_context>
chip_gen: v7x
topology: tpu7x:2x2x1
jax: 0.10.0
libtpu: 0.0.40
codegen_flags: <defaults>
</compile_context>

<pallas_src>
import functools
import math

import jax
import jax.numpy as jnp
from jax.experimental import pallas as pl
from jax.experimental.pallas import tpu as pltpu

_LANES = 128
_SUBLANES = 8
_TILE_BYTES_TARGET = 4 << 20      # ~4 MiB per block
_VMEM_LIMIT_BYTES = 32 << 20      # raise v5e's 16 MiB scoped default; <= physical everywhere
_PALLAS_MIN_BYTES = 256 << 10     # below this, launch overhead dominates -> plain XLA
_MAX_EXACT_FLAT = 1 << 24         # flat element index must stay exact in float32


def _round_up(n: int, m: int) -> int:
    return ((n + m - 1) // m) * m


def pe_rows(d_model: int, n_rows: int) -> jnp.ndarray:
    """First n_rows of the PyTorch sin/cos table (float32, shape (n_rows, d_model))."""
    position = jnp.arange(n_rows, dtype=jnp.float32)[:, None]
    div_term = jnp.exp(jnp.arange(0, d_model, 2, dtype=jnp.float32)
                       * (-math.log(10000.0) / d_model))
    pe = jnp.zeros((n_rows, d_model), dtype=jnp.float32)
    pe = pe.at[:, 0::2].set(jnp.sin(position * div_term))
    pe = pe.at[:, 1::2].set(jnp.cos(position * div_term))
    return pe


# --------------------------------------------------------------------------- #
# Kernels
# --------------------------------------------------------------------------- #
def _pe_fused_kernel(d_model, tile_rows, packed, x_ref, o_ref):
    """out = x * sqrt(d_model) + pe, with pe generated on the fly (no HBM stream)."""
    rows, width = x_ref.shape
    r = jax.lax.broadcasted_iota(jnp.int32, (rows, width), 0)
    c = jax.lax.broadcasted_iota(jnp.int32, (rows, width), 1)
    if packed:
        # Lane-dense flat view: recover (position, feature) = divmod(flat, d_model).
        flat = pl.program_id(0) * (tile_rows * width) + r * width + c
        pos = jnp.floor(flat.astype(jnp.float32) * (1.0 / d_model)).astype(jnp.int32)
        # +-1 fixups make the constant-divisor divmod exact (flat < 2**24 guaranteed).
        for _ in range(2):
            rem = flat - pos * d_model
            pos = jnp.where(rem >= d_model, pos + 1, jnp.where(rem < 0, pos - 1, pos))
        dim = flat - pos * d_model
    else:
        pos = pl.program_id(0) * tile_rows + r
        dim = c
    parity = dim & 1                                               # 0 -> sin col, 1 -> cos col
    inv_freq = jnp.exp((dim - parity).astype(jnp.float32)
                       * (-math.log(10000.0) / d_model))           # EUP
    angle = pos.astype(jnp.float32) * inv_freq
    pe = jnp.where(parity == 0, jnp.sin(angle), jnp.cos(angle))    # EUP
    scale = math.sqrt(d_model)
    o_ref[...] = (x_ref[...].astype(jnp.float32) * scale + pe).astype(o_ref.dtype)


def _pe_table_kernel(scale, x_ref, pe_ref, o_ref):
    """Fallback: out = x * scale + pe, pe streamed from HBM in x's dtype."""
    o_ref[...] = (x_ref[...].astype(jnp.float32) * scale
                  + pe_ref[...].astype(jnp.float32)).astype(o_ref.dtype)


# --------------------------------------------------------------------------- #
# pallas_call wrappers
# --------------------------------------------------------------------------- #
# input_output_aliases is intentionally omitted: the operand is a (bitcast) view
# of the jit parameter x, which stays live in callers, so XLA would insert a
# protective copy before donating -- a net loss for this memory-bound op.
@functools.partial(jax.jit, static_argnames=("view_rows", "view_cols", "tile_rows", "packed"))
def _fused_forward(x, *, view_rows, view_cols, tile_rows, packed):
    S, D = x.shape
    x_p = x.reshape(view_rows, view_cols)          # free row-major relayout
    spec = pl.BlockSpec((tile_rows, view_cols), lambda i: (i, 0))
    out_p = pl.pallas_call(
        functools.partial(_pe_fused_kernel, D, tile_rows, packed),
        out_shape=jax.ShapeDtypeStruct((view_rows, view_cols), x.dtype),
        grid=(pl.cdiv(view_rows, tile_rows),),
        in_specs=[spec],
        out_specs=spec,
        compiler_params=pltpu.CompilerParams(
            dimension_semantics=("parallel",),
            vmem_limit_bytes=_VMEM_LIMIT_BYTES,
        ),
    )(x_p)
    return out_p.reshape(S, D)


@functools.partial(jax.jit, static_argnames=("view_rows", "view_cols", "tile_rows"))
def _table_forward(x, pe, *, view_rows, view_cols, tile_rows):
    S, D = x.shape
    x_p = x.reshape(view_rows, view_cols)
    pe_p = pe.astype(x.dtype).reshape(view_rows, view_cols)   # stream pe in x's dtype
    spec = pl.BlockSpec((tile_rows, view_cols), lambda i: (i, 0))
    out_p = pl.pallas_call(
        functools.partial(_pe_table_kernel, math.sqrt(D)),
        out_shape=jax.ShapeDtypeStruct((view_rows, view_cols), x.dtype),
        grid=(pl.cdiv(view_rows, tile_rows),),
        in_specs=[spec, spec],
        out_specs=spec,
        compiler_params=pltpu.CompilerParams(
            dimension_semantics=("parallel",),
            vmem_limit_bytes=_VMEM_LIMIT_BYTES,
        ),
    )(x_p, pe_p)
    return out_p.reshape(S, D)


_fused_path_ok = True  # flipped to False if in-kernel sin/cos lowering is unavailable


def positional_encoding_forward(x: jnp.ndarray, *, max_len: int = 5000,
                                force_pallas: bool = False) -> jnp.ndarray:
    """PositionalEncoding.forward: x of shape (S, D) -> x * sqrt(D) + pe[:S]."""
    global _fused_path_ok
    S, D = x.shape
    if S > max_len:
        raise ValueError(f"seq_len {S} exceeds max_len {max_len}")
    itemsize = jnp.dtype(x.dtype).itemsize

    # Tiny-input escape hatch: pallas_call launch overhead dominates -> let XLA fuse.
    if not force_pallas and S * D * itemsize < _PALLAS_MIN_BYTES:
        return (x.astype(jnp.float32) * math.sqrt(D) + pe_rows(D, S)).astype(x.dtype)

    # ---- pick a lane-dense 2-D view of the contiguous (S, D) buffer ----
    if D % _LANES == 0:
        packed, view_rows, view_cols = False, S, D                     # already lane dense
    elif (S * D) % _LANES == 0 and S * D <= _MAX_EXACT_FLAT:
        packed, view_rows, view_cols = True, (S * D) // _LANES, _LANES  # flat packing
    else:
        packed, view_rows, view_cols = False, S, D                     # masked-store fallback

    # ---- row tiling: ~4 MiB blocks, multiple of 8, >= 2 grid steps when possible
    # (so dimension_semantics=("parallel",) can shard across both v7x TensorCores) ----
    if view_rows <= _SUBLANES:
        tile_rows = view_rows
    else:
        rows_budget = max(_SUBLANES,
                          (_TILE_BYTES_TARGET // (view_cols * itemsize))
                          // _SUBLANES * _SUBLANES)
        tile_rows = max(_SUBLANES,
                        min(rows_budget,
                            _round_up(pl.cdiv(view_rows, 2), _SUBLANES),
                            _round_up(view_rows, _SUBLANES)))

    kwargs = dict(view_rows=view_rows, view_cols=view_cols, tile_rows=tile_rows)
    if _fused_path_ok:
        try:
            return _fused_forward(x, packed=packed, **kwargs)
        except Exception:
            # In-kernel transcendental lowering unavailable on this runtime: fall back
            # to streaming the pe table (still lane-dense and tiled identically).
            _fused_path_ok = False
    return _table_forward(x, pe_rows(D, S), **kwargs)


if __name__ == "__main__":
    key = jax.random.PRNGKey(0)
    # (seq_len, d_model): hinted toy shape, a multi-block packed shape, an odd-width
    # shape exercising the generalized flat packing, one exercising the un-packed
    # fallback, and a lane-dense d_model.
    cases = [(8, 32), (64, 32), (24, 48), (10, 48), (256, 256)]
    for seq_len, d_model in cases:
        key, kx = jax.random.split(key)
        x = jax.random.normal(kx, (seq_len, d_model), dtype=jnp.float32)

        out = jax.block_until_ready(
            positional_encoding_forward(x, force_pallas=True))

        # Pure-JAX reference (same math as the PyTorch forward).
        ref = x * math.sqrt(d_model) + pe_rows(d_model, seq_len)
        assert out.shape == (seq_len, d_model)
        # In-kernel exp/sin/cos may differ from XLA's by a few ulps -> modest tolerance.
        assert jnp.allclose(out, ref, atol=1e-3, rtol=1e-3), (seq_len, d_model)

    print("KERNEL_OK")
</pallas_src>

<mosaic_0001>
module attributes {stable_mosaic.version = 11 : i64} {
  func.func @_pe_fused_kernel(%arg0: i32, %arg1: memref<2x128xf32, #tpu.memory_space<vmem>>, %arg2: memref<2x128xf32, #tpu.memory_space<vmem>>) attributes {dimension_semantics = [#tpu.dimension_semantics<parallel>], iteration_bounds = array<i64: 1>, scalar_prefetch = 0 : i64, scratch_operands = 0 : i64, tpu.core_type = #tpu.core_type<tc>, window_params = [{transform_indices = @transform_0, window_bounds = array<i64: 2, 128>}, {transform_indices = @transform_1, window_bounds = array<i64: 2, 128>}]} {
    %0 = tpu.iota {dimensions = array<i32: 0>} : vector<2x128xi32>
    %1 = tpu.iota {dimensions = array<i32: 1>} : vector<2x128xi32>
    %c256_i32 = arith.constant 256 : i32
    %2 = arith.muli %arg0, %c256_i32 : i32
    %c128_i32 = arith.constant 128 : i32
    %3 = vector.broadcast %c128_i32 : i32 to vector<2x128xi32>
    %4 = arith.muli %0, %3 : vector<2x128xi32>
    %5 = vector.broadcast %2 : i32 to vector<2x128xi32>
    %6 = arith.addi %5, %4 : vector<2x128xi32>
    %7 = arith.addi %6, %1 : vector<2x128xi32>
    %8 = arith.sitofp %7 : vector<2x128xi32> to vector<2x128xf32>
    %cst = arith.constant 3.125000e-02 : f32
    %9 = vector.broadcast %cst : f32 to vector<2x128xf32>
    %10 = arith.mulf %8, %9 : vector<2x128xf32>
    %11 = math.floor %10 : vector<2x128xf32>
    %12 = arith.fptosi %11 : vector<2x128xf32> to vector<2x128xi32>
    %c32_i32 = arith.constant 32 : i32
    %13 = vector.broadcast %c32_i32 : i32 to vector<2x128xi32>
    %14 = arith.muli %12, %13 : vector<2x128xi32>
    %15 = arith.subi %7, %14 : vector<2x128xi32>
    %c32_i32_0 = arith.constant 32 : i32
    %16 = vector.broadcast %c32_i32_0 : i32 to vector<2x128xi32>
    %17 = arith.cmpi sge, %15, %16 : vector<2x128xi32>
    %c1_i32 = arith.constant 1 : i32
    %18 = vector.broadcast %c1_i32 : i32 to vector<2x128xi32>
    %19 = arith.addi %12, %18 : vector<2x128xi32>
    %c0_i32 = arith.constant 0 : i32
    %20 = vector.broadcast %c0_i32 : i32 to vector<2x128xi32>
    %21 = arith.cmpi slt, %15, %20 : vector<2x128xi32>
    %c1_i32_1 = arith.constant 1 : i32
    %22 = vector.broadcast %c1_i32_1 : i32 to vector<2x128xi32>
    %23 = arith.subi %12, %22 : vector<2x128xi32>
    %24 = arith.select %21, %23, %12 : vector<2x128xi1>, vector<2x128xi32>
    %25 = arith.select %17, %19, %24 : vector<2x128xi1>, vector<2x128xi32>
    %c32_i32_2 = arith.constant 32 : i32
    %26 = vector.broadcast %c32_i32_2 : i32 to vector<2x128xi32>
    %27 = arith.muli %25, %26 : vector<2x128xi32>
    %28 = arith.subi %7, %27 : vector<2x128xi32>
    %c32_i32_3 = arith.constant 32 : i32
    %29 = vector.broadcast %c32_i32_3 : i32 to vector<2x128xi32>
    %30 = arith.cmpi sge, %28, %29 : vector<2x128xi32>
    %c1_i32_4 = arith.constant 1 : i32
    %31 = vector.broadcast %c1_i32_4 : i32 to vector<2x128xi32>
    %32 = arith.addi %25, %31 : vector<2x128xi32>
    %c0_i32_5 = arith.constant 0 : i32
    %33 = vector.broadcast %c0_i32_5 : i32 to vector<2x128xi32>
    %34 = arith.cmpi slt, %28, %33 : vector<2x128xi32>
    %c1_i32_6 = arith.constant 1 : i32
    %35 = vector.broadcast %c1_i32_6 : i32 to vector<2x128xi32>
    %36 = arith.subi %25, %35 : vector<2x128xi32>
    %37 = arith.select %34, %36, %25 : vector<2x128xi1>, vector<2x128xi32>
    %38 = arith.select %30, %32, %37 : vector<2x128xi1>, vector<2x128xi32>
    %c32_i32_7 = arith.constant 32 : i32
    %39 = vector.broadcast %c32_i32_7 : i32 to vector<2x128xi32>
    %40 = arith.muli %38, %39 : vector<2x128xi32>
    %41 = arith.subi %7, %40 : vector<2x128xi32>
    %c1_i32_8 = arith.constant 1 : i32
    %42 = vector.broadcast %c1_i32_8 : i32 to vector<2x128xi32>
    %43 = arith.andi %41, %42 : vector<2x128xi32>
    %44 = arith.subi %41, %43 : vector<2x128xi32>
    %45 = arith.sitofp %44 : vector<2x128xi32> to vector<2x128xf32>
    %cst_9 = arith.constant -0.287823141 : f32
    %46 = vector.broadcast %cst_9 : f32 to vector<2x128xf32>
    %47 = arith.mulf %45, %46 : vector<2x128xf32>
    %48 = math.exp %47 : vector<2x128xf32>
    %49 = arith.sitofp %38 : vector<2x128xi32> to vector<2x128xf32>
    %50 = arith.mulf %49, %48 : vector<2x128xf32>
    %c0_i32_10 = arith.constant 0 : i32
    %51 = vector.broadcast %c0_i32_10 : i32 to vector<2x128xi32>
    %52 = arith.cmpi eq, %43, %51 : vector<2x128xi32>
    %53 = math.sin %50 : vector<2x128xf32>
    %54 = math.cos %50 : vector<2x128xf32>
    %55 = arith.select %52, %53, %54 : vector<2x128xi1>, vector<2x128xf32>
    %c0 = arith.constant 0 : index
    %c0_11 = arith.constant 0 : index
    %56 = vector.load %arg1[%c0, %c0_11] : memref<2x128xf32, #tpu.memory_space<vmem>>, vector<2x128xf32>
    %cst_12 = arith.constant 5.65685415 : f32
    %57 = vector.broadcast %cst_12 : f32 to vector<2x128xf32>
    %58 = arith.mulf %56, %57 : vector<2x128xf32>
    %59 = arith.addf %58, %55 : vector<2x128xf32>
    %c0_13 = arith.constant 0 : index
    %c0_14 = arith.constant 0 : index
    %60 = vector.load %arg2[%c0_13, %c0_14] : memref<2x128xf32, #tpu.memory_space<vmem>>, vector<2x128xf32>
    tpu.vector_store %arg2[%c0_13, %c0_14], %59 {strides = array<i32>} : memref<2x128xf32, #tpu.memory_space<vmem>>, vector<2x128xf32>,
    return
  }
  func.func @transform_0(%arg0: i32) -> (i32, i32) {
    %c0_i32 = arith.constant 0 : i32
    %c0_i32_0 = arith.constant 0 : i32
    return %arg0, %c0_i32 : i32, i32
  }
  func.func @transform_1(%arg0: i32) -> (i32, i32) {
    %c0_i32 = arith.constant 0 : i32
    %c0_i32_0 = arith.constant 0 : i32
    return %arg0, %c0_i32 : i32, i32
  }
}

module attributes {stable_mosaic.version = 11 : i64} {
  func.func @_pe_table_kernel(%arg0: i32, %arg1: memref<2x128xf32, #tpu.memory_space<vmem>>, %arg2: memref<2x128xf32, #tpu.memory_space<vmem>>, %arg3: memref<2x128xf32, #tpu.memory_space<vmem>>) attributes {dimension_semantics = [#tpu.dimension_semantics<parallel>], iteration_bounds = array<i64: 1>, scalar_prefetch = 0 : i64, scratch_operands = 0 : i64, tpu.core_type = #tpu.core_type<tc>, window_params = [{transform_indices = @transform_0, window_bounds = array<i64: 2, 128>}, {transform_indices = @transform_1, window_bounds = array<i64: 2, 128>}, {transform_indices = @transform_2, window_bounds = array<i64: 2, 128>}]} {
    %c0 = arith.constant 0 : index
    %c0_0 = arith.constant 0 : index
    %0 = vector.load %arg1[%c0, %c0_0] : memref<2x128xf32, #tpu.memory_space<vmem>>, vector<2x128xf32>
    %cst = arith.constant 5.65685415 : f32
    %1 = vector.broadcast %cst : f32 to vector<2x128xf32>
    %2 = arith.mulf %0, %1 : vector<2x128xf32>
    %c0_1 = arith.constant 0 : index
    %c0_2 = arith.constant 0 : index
    %3 = vector.load %arg2[%c0_1, %c0_2] : memref<2x128xf32, #tpu.memory_space<vmem>>, vector<2x128xf32>
    %4 = arith.addf %2, %3 : vector<2x128xf32>
    %c0_3 = arith.constant 0 : index
    %c0_4 = arith.constant 0 : index
    %5 = vector.load %arg3[%c0_3, %c0_4] : memref<2x128xf32, #tpu.memory_space<vmem>>, vector<2x128xf32>
    tpu.vector_store %arg3[%c0_3, %c0_4], %4 {strides = array<i32>} : memref<2x128xf32, #tpu.memory_space<vmem>>, vector<2x128xf32>,
    return
  }
  func.func @transform_0(%arg0: i32) -> (i32, i32) {
    %c0_i32 = arith.constant 0 : i32
    %c0_i32_0 = arith.constant 0 : i32
    return %arg0, %c0_i32 : i32, i32
  }
  func.func @transform_1(%arg0: i32) -> (i32, i32) {
    %c0_i32 = arith.constant 0 : i32
    %c0_i32_0 = arith.constant 0 : i32
    return %arg0, %c0_i32 : i32, i32
  }
  func.func @transform_2(%arg0: i32) -> (i32, i32) {
    %c0_i32 = arith.constant 0 : i32
    %c0_i32_0 = arith.constant 0 : i32
    return %arg0, %c0_i32 : i32, i32
  }
}

</mosaic_0001>

<bundles_post_ra>
// kernel: _fused_forward.1
= control target key start
LH: loop header
LB: loop body
LE: loop exit
PB: predicated region body
PF: predicated region fallthrough
CT: control target
= control target key end

     0   :  { %v8_v0 = vlaneseq  ;;  %v292_v43 = vmov 683565275   ;;  %v293_v45 = vmov 2475754826   ;;  %v294_v47 = vmov 2131351028   ;;  %s343_s0 = inlined_call_operand.vmem [shape: f32[2,128], index: 0, kind: input, shape index: {}]   ;;  %s344_s1 = inlined_call_operand.vmem [shape: f32[2,128], index: 1, kind: output, shape index: {}]  }
   0x1   :  { %v295_v49 = vmov 2102212464   ;;  %v296_v51 = vmov 920167782   ;;  %v297_v58 = vmov 1326507024  }
   0x2   :  { %v9_v1 = vshrl.u32 %v8_v0, 7  ;;  %v11_v2 = vand.u32 127, %v8_v0 }
   0x4   :  { %v13_v3 = vmul.u32 128, %v9_v1 }
   0x6   :  { %v16_v4 = vadd.s32 %v13_v3, %v11_v2 }
   0x8   :  { %v17_v5 = vcvt.s32.f32 %v16_v4 }
   0xa   :  { %v18_v6 = vmul.f32 0.03125, %v17_v5 }
   0xc   :  { %v19_v7 = vfloor.f32 %v18_v6 }
   0xe   :  { %v274_v8 = vtrunc.f32 %v19_v7 }
  0x10   :  { %v275_v9 = vcvt.f32.s32 %v274_v8 }
  0x12   :  { %v21_v10 = vmul.u32 32, %v275_v9  ;;  %v264_v11 = vadd.s32 4294967295, %v275_v9  ;;  %v24_v13 = vadd.s32 1, %v275_v9 }
  0x14   :  { %v22_v12 = vsub.s32 %v16_v4, %v21_v10 }
  0x16   :  { %vm23_vm0 = vcmp.ge.s32.totalorder %v22_v12, 32  ;;  %vm25_vm1 = vcmp.lt.s32.totalorder %v22_v12, 0 }
  0x17   :  { %v27_v14 = vsel %vm25_vm1, %v264_v11, %v275_v9 }
  0x18   :  { %v28_v15 = vsel %vm23_vm0, %v24_v13, %v27_v14 }
  0x19   :  { %v29_v16 = vmul.u32 32, %v28_v15  ;;  %v265_v17 = vadd.s32 4294967295, %v28_v15  ;;  %v32_v19 = vadd.s32 1, %v28_v15 }
  0x1b   :  { %v30_v18 = vsub.s32 %v16_v4, %v29_v16 }
  0x1d   :  { %vm31_vm2 = vcmp.ge.s32.totalorder %v30_v18, 32  ;;  %vm33_vm3 = vcmp.lt.s32.totalorder %v30_v18, 0 }
  0x1e   :  { %v35_v20 = vsel %vm33_vm3, %v265_v17, %v28_v15 }
  0x1f   :  { %v36_v21 = vsel %vm31_vm2, %v32_v19, %v35_v20 }
  0x20   :  { %v37_v22 = vmul.u32 32, %v36_v21  ;;  %v45_v29 = vcvt.s32.f32 %v36_v21 }
  0x22   :  { %v308_v23 = vsub.s32 %v16_v4, %v37_v22 }
  0x24   :  { %v39_v24 = vand.u32 1, %v308_v23 }
  0x26   :  { %v40_v25 = vsub.s32 %v308_v23, %v39_v24 }
  0x28   :  { %v41_v26 = vcvt.s32.f32 %v40_v25 }
  0x2a   :  { %v42_v27 = vmul.f32 -0.28782314, %v41_v26 }
  0x2c   :  { %v43_v28 = vmul.f32 1.442695, %v42_v27 }
  0x2e   :  { %286 = vpow2.f32 %v43_v28 }
  0x38   :  { %v287_v30 = vpop.eup %286 }
  0x39   :  { %v314_v31 = vmul.f32 %v287_v30, %v45_v29 }
  0x3b   :  { %v51_v32 = vand.u32 2139095040, %v314_v31  ;;  %v48_v34 = vand.u32 2147483647, %v314_v31  ;;  %vm50_vm11 = vcmp.lt.s32.totalorder %v314_v31, 0  ;;  %vm140_vm3 = vweird.f32 %v314_v31 }
  0x3d   :  { %v52_v33 = vshrl.u32 %v51_v32, 23  ;;  %v55_v37 = vand.u32 8388607, %v48_v34  ;;  %vm49_vm12 = vcmp.le.f32.partialorder %v48_v34, 0.7853982 }
  0x3e   :  { %v256_v34 = vld [vmem:[%s343_s0] sm:$0x3] }
  0x3f   :  { %v266_v35 = vadd.s32 4294967169, %v52_v33  ;;  %v56_v40 = vor.u32 8388608, %v55_v37 }
  0x41   :  { %v58_v36 = vadd.s32 1, %v266_v35  ;;  %v96_v60 = vshll.u32 %v56_v40, 8 }
  0x43   :  { %vm59_vm4 = vcmp.gt.s32.totalorder %v58_v36, 0 }
  0x44   :  { %v60_v38 = vsel %vm59_vm4, %v58_v36, 0  ;;  %vm47_vm4 = vcmp.eq.s32.totalorder %v39_v24, 0 }
  0x45   :  { %v62_v39 = vand.u32 31, %v60_v38  ;;  %v61_v41 = vshrl.u32 %v60_v38, 5 }
  0x47   :  { %v63_v42 = vsub.s32 32, %v62_v39  ;;  %v65_v44 = vshll.u32 %v292_v43, %v62_v39  ;;  %v68_v46 = vshll.u32 %v293_v45, %v62_v39  ;;  %v71_v48 = vshll.u32 %v294_v47, %v62_v39 }
  0x48   :  { %v74_v50 = vshll.u32 %v295_v49, %v62_v39  ;;  %v77_v52 = vshll.u32 %v296_v51, %v62_v39  ;;  %vm80_vm5 = vcmp.lt.s32.totalorder %v61_v41, 1  ;;  %vm83_vm6 = vcmp.lt.s32.totalorder %v61_v41, 4 }
  0x49   :  { %v64_v53 = vshrl.u32 %v292_v43, %v63_v42  ;;  %v66_v54 = vshrl.u32 %v293_v45, %v63_v42  ;;  %v69_v55 = vshrl.u32 %v294_v47, %v63_v42  ;;  %v72_v56 = vshrl.u32 %v295_v49, %v63_v42 }
  0x4a   :  { %v75_v57 = vshrl.u32 %v296_v51, %v63_v42  ;;  %v78_v59 = vshrl.u32 %v297_v58, %v63_v42  ;;  %vm81_vm7 = vcmp.lt.s32.totalorder %v61_v41, 2  ;;  %vm82_vm8 = vcmp.lt.s32.totalorder %v61_v41, 3 }
  0x4b   :  { %v67_v61 = vor.u32 %v66_v54, %v65_v44  ;;  %v70_v62 = vor.u32 %v69_v55, %v68_v46  ;;  %v73_v63 = vor.u32 %v72_v56, %v71_v48 }
  0x4c   :  { %v76_v0 = vor.u32 %v75_v57, %v74_v50  ;;  %v79_v1 = vor.u32 %v78_v59, %v77_v52 }
  0x4d   :  { %v84_v2 = vsel %vm80_vm5, %v64_v53, %v67_v61  ;;  %v85_v3 = vsel %vm83_vm6, %v73_v63, 2102212464  ;;  %v88_v4 = vsel %vm80_vm5, %v67_v61, %v70_v62  ;;  %v92_v5 = vsel %vm80_vm5, %v70_v62, %v73_v63 }
  0x4e   :  { %v86_v6 = vsel %vm82_vm8, %v70_v62, %v85_v3  ;;  %v89_v7 = vsel %vm83_vm6, %v76_v0, 920167782  ;;  %v93_v8 = vsel %vm83_vm6, %v79_v1, 1326507024 }
  0x4f   :  { %v90_v9 = vsel %vm82_vm8, %v73_v63, %v89_v7  ;;  %v94_v10 = vsel %vm82_vm8, %v76_v0, %v93_v8  ;;  %v87_v11 = vsel %vm81_vm7, %v84_v2, %v86_v6  ;;  %v257_v0 = vmul.f32 5.656854, %v256_v34 }
  0x50   :  { %v91_v12 = vsel %vm81_vm7, %v88_v4, %v90_v9  ;;  %v95_v13 = vsel %vm81_vm7, %v92_v5, %v94_v10  ;;  %v103_v18 = vmul.u32 %v96_v60, %v87_v11 }
  0x51   :  { %v320_v14 = vmul.u32.u64.low %v96_v60, %v95_v13  ;;  %v321_v15 = vmul.u32.u64.high %v96_v60, %v95_v13, %v320_v14  ;;  %v323_v16 = vmul.u32.u64.low %v96_v60, %v91_v12  ;;  %v324_v17 = vmul.u32.u64.high %v96_v60, %v91_v12, %v323_v16 }
  0x53   :  { %vm105_vm9 = vc.u32 %v321_v15, %v323_v16  ;;  %v106_v19 = vadd.s32 1, %v324_v17  ;;  %v104_v33 = vadd.s32 %v323_v16, %v321_v15 }
  0x55   :  { %v107_v20 = vsel %vm105_vm9, %v106_v19, %v324_v17 }
  0x56   :  { %v108_v21 = vadd.s32 %v107_v20, %v103_v18 }
  0x58   :  { %v109_v22 = vadd.s32 536870912, %v108_v21 }
  0x5a   :  { %v110_v25 = vshrl.u32 %v109_v22, 30 }
  0x5c   :  { %v111_v26 = vshll.u32 %v110_v25, 30  ;;  %v134_v46 = vsub.s32 4, %v110_v25 }
  0x5e   :  { %v112_v27 = vsub.s32 %v108_v21, %v111_v26  ;;  %v135_v49 = vsel %vm50_vm11, %v134_v46, %v110_v25 }
  0x5f   :  { %v137_v52 = vsel %vm49_vm12, 0, %v135_v49 }
  0x60   :  { %v114_v28 = vsub.s32 0, %v112_v27  ;;  %v141_v53 = vadd.s32 3, %v137_v52  ;;  %v245_v55 = vand.u32 3, %v137_v52 }
  0x62   :  { %v267_v29 = vmin.u32 %v114_v28, %v112_v27  ;;  %v142_v54 = vand.u32 3, %v141_v53  ;;  %vm250_vm14 = vcmp.eq.s32.totalorder %v245_v55, 2  ;;  %vm247_vm0 = vcmp.eq.s32.totalorder %v245_v55, 0 }
  0x63   :  { %vm246_vm2 = vcmp.lt.s32.totalorder %v245_v55, 2 }
  0x64   :  { %v116_v30 = vclz %v267_v29  ;;  %vm147_vm13 = vcmp.eq.s32.totalorder %v142_v54, 2  ;;  %vm144_vm15 = vcmp.eq.s32.totalorder %v142_v54, 0  ;;  %vm143_vm1 = vcmp.lt.s32.totalorder %v142_v54, 2 }
  0x66   :  { %v268_v32 = vadd.s32 4294967294, %v116_v30 }
  0x68   :  { %vm269_vm10 = vcmp.lt.s32.totalorder %v268_v32, 0 }
  0x69   :  { %v119_v35 = vsel %vm269_vm10, 0, %v268_v32 }
  0x6a   :  { %v120_v36 = vsub.s32 32, %v119_v35  ;;  %v121_v37 = vshll.u32 %v112_v27, %v119_v35  ;;  %v124_v38 = vsub.s32 4294967266, %v119_v35 }
  0x6c   :  { %v122_v39 = vshrl.u32 %v104_v33, %v120_v36  ;;  %v125_v40 = vadd.s32 127, %v124_v38 }
  0x6e   :  { %v123_v41 = vor.u32 %v122_v39, %v121_v37  ;;  %v126_v42 = vshll.u32 %v125_v40, 23 }
  0x70   :  { %v127_v43 = vor.u32 4788187, %v126_v42  ;;  %v130_v44 = vcvt.s32.f32 %v123_v41 }
  0x72   :  { %v128_v45 = vand.u32 2147483647, %v127_v43 }
  0x74   :  { %v131_v47 = vmul.f32 %v130_v44, %v128_v45 }
  0x76   :  { %v132_v48 = vxor.u32 2147483648, %v131_v47 }
  0x78   :  { %v133_v50 = vsel %vm50_vm11, %v132_v48, %v131_v47 }
  0x79   :  { %v136_v51 = vsel %vm49_vm12, %v314_v31, %v133_v50 }
  0x7a   :  { %288 = vcosq.f32 %v136_v51 }
  0x7b   :  { %290 = vsinq.f32 %v136_v51 }
  0x84   :  { %v289_v56 = vpop.eup %288 }
  0x85   :  { %v291_v57 = vpop.eup %290  ;;  %v148_v58 = vxor.u32 2147483648, %v289_v56 }
  0x86   :  { %v145_v59 = vxor.u32 2147483648, %v291_v57 }
  0x87   :  { %v149_v60 = vsel %vm147_vm13, %v148_v58, %v291_v57  ;;  %v252_v61 = vsel %vm250_vm14, %v148_v58, %v291_v57 }
  0x88   :  { %v146_v62 = vsel %vm144_vm15, %v289_v56, %v145_v59  ;;  %v249_v63 = vsel %vm247_vm0, %v289_v56, %v145_v59 }
  0x89   :  { %v150_v1 = vsel %vm143_vm1, %v146_v62, %v149_v60  ;;  %v253_v2 = vsel %vm246_vm2, %v249_v63, %v252_v61 }
  0x8a   :  { %v151_v3 = vsel %vm140_vm3, nan, %v150_v1  ;;  %v254_v4 = vsel %vm140_vm3, nan, %v253_v2 }
  0x8b   :  { %v255_v5 = vsel %vm47_vm4, %v151_v3, %v254_v4 }
  0x8c   :  { %v258_v6 = vadd.f32 %v257_v0, %v255_v5 }
  0x8e   :  { %259 = vst [vmem:[%s344_s1] sm:$0x3] %v258_v6 }

// kernel: _table_forward.1
= control target key start
LH: loop header
LB: loop body
LE: loop exit
PB: predicated region body
PF: predicated region fallthrough
CT: control target
= control target key end

     0   :  { %s44_s0 = inlined_call_operand.vmem [shape: f32[2,128], index: 0, kind: input, shape index: {}]   ;;  %s45_s1 = inlined_call_operand.vmem [shape: f32[2,128], index: 1, kind: input, shape index: {}]   ;;  %s46_s2 = inlined_call_operand.vmem [shape: f32[2,128], index: 2, kind: output, shape index: {}]  }
   0x1   :  { %v11_v0 = vld [vmem:[%s44_s0] sm:$0x3] }
   0x2   :  { %v13_v1 = vld [vmem:[%s45_s1] sm:$0x3]  ;;  %v12_v2 = vmul.f32 5.656854, %v11_v0 }
   0x4   :  { %v14_v3 = vadd.f32 %v13_v1, %v12_v2 }
   0x6   :  { %15 = vst [vmem:[%s46_s2] sm:$0x3] %v14_v3 }

</bundles_post_ra>
